<compile_context>
chip_gen: v7x
topology: tpu7x:2x2x1
jax: 0.10.0
libtpu: 0.0.40
codegen_flags: <defaults>
</compile_context>

<pallas_src>
import functools

import jax
import jax.numpy as jnp
from jax.experimental import pallas as pl
from jax.experimental.pallas import tpu as pltpu


def _cdiv(a, b):
    return -(-a // b)


# ----------------------------- Pallas kernels ------------------------------ #

def _pool_gate_kernel(x_ref, w1_ref, b1_ref, w2_ref, b2_ref, g_ref, acc_ref, *, inv_hw):
    """Global-avg-pool accumulation + fused SE MLP on the final spatial tile."""
    s = pl.program_id(1)

    @pl.when(s == 0)
    def _():
        acc_ref[...] = jnp.zeros_like(acc_ref)

    xb = x_ref[0].astype(jnp.float32)                       # (C, THW)
    acc_ref[...] += jnp.sum(xb, axis=-1, keepdims=True)     # (C, 1) partial sums

    @pl.when(s == pl.num_programs(1) - 1)
    def _():
        pooled = acc_ref[...] * inv_hw                      # (C, 1)  avg pool
        h = jnp.dot(w1_ref[...], pooled,
                    preferred_element_type=jnp.float32)     # conv_reduce (1x1)
        h = jnp.maximum(h + b1_ref[...], 0.0)               # + bias, ReLU
        z = jnp.dot(w2_ref[...], h,
                    preferred_element_type=jnp.float32)     # conv_expand (1x1)
        z = z + b2_ref[...]
        g_ref[0] = jax.nn.sigmoid(z).astype(g_ref.dtype)    # gate_fn


def _scale_kernel(x_ref, g_ref, o_ref):
    x = x_ref[0].astype(jnp.float32)                        # (C, THW)
    g = g_ref[0].astype(jnp.float32)                        # (C, 1)
    o_ref[0] = (x * g).astype(o_ref.dtype)                  # x * x_se.expand_as(x)


# ------------------------------- JAX wrapper -------------------------------- #

def _spatial_tile(c, hw, itemsize, target_bytes=2 << 20):
    """Lane tile (multiple of 128) sized so one (C, THW) block is ~<=2 MiB:
    with double-buffered input + output blocks this fits the default
    scoped-VMEM limit on every generation (16 MiB v5e, 32 MiB v6e/v7x) and
    the 64 MiB physical VMEM on v7x with plenty of headroom."""
    t = (target_bytes // max(c * itemsize, 1)) // 128 * 128
    t = max(128, min(t, 2048))
    t = min(t, _cdiv(hw, 128) * 128)
    hw_pad = _cdiv(hw, t) * t
    return t, hw_pad


def init_params(key, c1, c2, se_ratio=0.25):
    reduced = int(c1 * se_ratio)
    k1, k2, k3, k4 = jax.random.split(key, 4)
    return dict(
        # PyTorch Conv2d weight (out, in, 1, 1) squeezed to (out, in); bias (out, 1).
        w_reduce=0.3 * jax.random.normal(k1, (reduced, c1), jnp.float32),
        b_reduce=0.1 * jax.random.normal(k2, (reduced, 1), jnp.float32),
        w_expand=0.3 * jax.random.normal(k3, (c2, reduced), jnp.float32),
        b_expand=0.1 * jax.random.normal(k4, (c2, 1), jnp.float32),
    )


def squeeze_excite_forward(params, x):
    N, C, H, W = x.shape
    hw = H * W
    c2 = params["w_expand"].shape[0]
    cr = params["w_reduce"].shape[0]
    assert c2 == C, "x * gate.expand_as(x) requires c2 == c1"

    thw, hw_pad = _spatial_tile(C, hw, x.dtype.itemsize)
    n_tiles = hw_pad // thw

    xf = x.reshape(N, C, hw)
    if hw_pad != hw:
        # Zero padding: contributes nothing to the pooled sum (we divide by the
        # real H*W); padded output columns are sliced off below.
        xf = jnp.pad(xf, ((0, 0), (0, 0), (0, hw_pad - hw)))

    w1 = params["w_reduce"].astype(jnp.float32)   # (Cr, C)
    b1 = params["b_reduce"].astype(jnp.float32)   # (Cr, 1)
    w2 = params["w_expand"].astype(jnp.float32)   # (C,  Cr)
    b2 = params["b_expand"].astype(jnp.float32)   # (C,  1)

    itemsize = x.dtype.itemsize

    # --- Kernel 1: global average pool + fused SE MLP -> per-(N, C) gate ----
    gate = pl.pallas_call(
        functools.partial(_pool_gate_kernel, inv_hw=1.0 / float(hw)),
        out_shape=jax.ShapeDtypeStruct((N, C, 1), jnp.float32),
        grid_spec=pltpu.PrefetchScalarGridSpec(
            num_scalar_prefetch=0,
            grid=(N, n_tiles),
            in_specs=[
                pl.BlockSpec((1, C, thw), lambda n, s: (n, 0, s)),
                pl.BlockSpec((cr, C), lambda n, s: (0, 0)),   # resident weights
                pl.BlockSpec((cr, 1), lambda n, s: (0, 0)),
                pl.BlockSpec((C, cr), lambda n, s: (0, 0)),
                pl.BlockSpec((C, 1), lambda n, s: (0, 0)),
            ],
            out_specs=pl.BlockSpec((1, C, 1), lambda n, s: (n, 0, 0)),
            scratch_shapes=[pltpu.VMEM((C, 1), jnp.float32)],
        ),
        compiler_params=pltpu.CompilerParams(
            dimension_semantics=("parallel", "arbitrary")),
        cost_estimate=pl.CostEstimate(
            flops=int(N * C * hw_pad + 4 * N * C * cr),
            transcendentals=int(N * C),
            bytes_accessed=int(xf.size * itemsize + N * C * 4
                               + (w1.size + b1.size + w2.size + b2.size) * 4),
        ),
    )(xf, w1, b1, w2, b2)

    # --- Kernel 2: broadcast-scale x by the gate (lane-dense stores) --------
    y = pl.pallas_call(
        _scale_kernel,
        out_shape=jax.ShapeDtypeStruct((N, C, hw_pad), x.dtype),
        grid_spec=pltpu.PrefetchScalarGridSpec(
            num_scalar_prefetch=0,
            grid=(N, n_tiles),
            in_specs=[
                pl.BlockSpec((1, C, thw), lambda n, s: (n, 0, s)),
                pl.BlockSpec((1, C, 1), lambda n, s: (n, 0, 0)),
            ],
            out_specs=pl.BlockSpec((1, C, thw), lambda n, s: (n, 0, s)),
        ),
        compiler_params=pltpu.CompilerParams(
            dimension_semantics=("parallel", "parallel")),
        cost_estimate=pl.CostEstimate(
            flops=int(N * C * hw_pad),
            transcendentals=0,
            bytes_accessed=int(2 * xf.size * itemsize + N * C * 4),
        ),
    )(xf, gate)

    if hw_pad != hw:
        y = y[:, :, :hw]
    return y.reshape(N, C, H, W)


if __name__ == "__main__":
    key = jax.random.PRNGKey(0)
    kp, kx = jax.random.split(key)

    c1 = c2 = 8                      # se_ratio=0.25 -> reduced_chs = 2
    params = init_params(kp, c1, c2, se_ratio=0.25)
    x = jax.random.normal(kx, (2, c1, 16, 16), jnp.float32)

    fwd = jax.jit(functools.partial(squeeze_excite_forward, params))
    out = fwd(x)
    jax.block_until_ready(out)

    # Pure-JAX reference of the PyTorch forward.
    pooled = jnp.mean(x, axis=(2, 3))                                      # avg_pool
    h = jax.nn.relu(pooled @ params["w_reduce"].T + params["b_reduce"][:, 0])
    g = jax.nn.sigmoid(h @ params["w_expand"].T + params["b_expand"][:, 0])
    ref = x * g[:, :, None, None]

    assert out.shape == x.shape and out.dtype == x.dtype, (out.shape, out.dtype)
    assert bool(jnp.all(jnp.isfinite(out)))
    assert jnp.allclose(out, ref, rtol=1e-5, atol=1e-5), float(jnp.max(jnp.abs(out - ref)))
    print("KERNEL_OK")
</pallas_src>

<mosaic_0001>
module attributes {stable_mosaic.version = 11 : i64} {
  func.func @_pool_gate_kernel(%arg0: i32, %arg1: i32, %arg2: memref<1x8x256xf32, #tpu.memory_space<vmem>>, %arg3: memref<2x8xf32, #tpu.memory_space<vmem>>, %arg4: memref<2x1xf32, #tpu.memory_space<vmem>>, %arg5: memref<8x2xf32, #tpu.memory_space<vmem>>, %arg6: memref<8x1xf32, #tpu.memory_space<vmem>>, %arg7: memref<1x8x1xf32, #tpu.memory_space<vmem>>, %arg8: memref<8x1xf32, #tpu.memory_space<vmem>>) attributes {dimension_semantics = [#tpu.dimension_semantics<parallel>, #tpu.dimension_semantics<arbitrary>], iteration_bounds = array<i64: 2, 1>, scalar_prefetch = 0 : i64, scratch_operands = 1 : i64, tpu.core_type = #tpu.core_type<tc>, window_params = [{transform_indices = @transform_0, window_bounds = array<i64: 1, 8, 256>}, {pipeline_mode = #tpu.pipeline_mode<synchronous>, transform_indices = @transform_1, window_bounds = array<i64: 2, 8>}, {pipeline_mode = #tpu.pipeline_mode<synchronous>, transform_indices = @transform_2, window_bounds = array<i64: 2, 1>}, {pipeline_mode = #tpu.pipeline_mode<synchronous>, transform_indices = @transform_3, window_bounds = array<i64: 8, 2>}, {pipeline_mode = #tpu.pipeline_mode<synchronous>, transform_indices = @transform_4, window_bounds = array<i64: 8, 1>}, {transform_indices = @transform_5, window_bounds = array<i64: 1, 8, 1>}]} {
    %c0_i32 = arith.constant 0 : i32
    %0 = arith.cmpi eq, %arg1, %c0_i32 : i32
    %1 = arith.extui %0 : i1 to i32
    %c0_i32_0 = arith.constant 0 : i32
    %2 = arith.cmpi ne, %1, %c0_i32_0 : i32
    scf.if %2 {
      %cst_9 = arith.constant 0.000000e+00 : f32
      %13 = vector.broadcast %cst_9 : f32 to vector<8x1xf32>
      %c0_10 = arith.constant 0 : index
      %c0_11 = arith.constant 0 : index
      %14 = vector.load %arg8[%c0_10, %c0_11] : memref<8x1xf32, #tpu.memory_space<vmem>>, vector<8x1xf32>
      tpu.vector_store %arg8[%c0_10, %c0_11], %13 {strides = array<i32>} : memref<8x1xf32, #tpu.memory_space<vmem>>, vector<8x1xf32>,
    } else {
    }
    %c0 = arith.constant 0 : index
    %c0_1 = arith.constant 0 : index
    %c0_2 = arith.constant 0 : index
    %3 = vector.load %arg2[%c0, %c0_1, %c0_2] : memref<1x8x256xf32, #tpu.memory_space<vmem>>, vector<1x8x256xf32>
    %4 = vector.shape_cast %3 : vector<1x8x256xf32> to vector<8x256xf32>
    %c0_3 = arith.constant 0 : index
    %c0_4 = arith.constant 0 : index
    %5 = vector.load %arg8[%c0_3, %c0_4] : memref<8x1xf32, #tpu.memory_space<vmem>>, vector<8x1xf32>
    %cst = arith.constant dense<0.000000e+00> : vector<8xf32>
    %6 = vector.multi_reduction <add>, %4, %cst [1] : vector<8x256xf32> to vector<8xf32>
    %7 = vector.shape_cast %6 : vector<8xf32> to vector<8x1xf32>
    %8 = arith.addf %5, %7 : vector<8x1xf32>
    %c0_5 = arith.constant 0 : index
    %c0_6 = arith.constant 0 : index
    %9 = vector.load %arg8[%c0_5, %c0_6] : memref<8x1xf32, #tpu.memory_space<vmem>>, vector<8x1xf32>
    tpu.vector_store %arg8[%c0_5, %c0_6], %8 {strides = array<i32>} : memref<8x1xf32, #tpu.memory_space<vmem>>, vector<8x1xf32>,
    %c0_i32_7 = arith.constant 0 : i32
    %10 = arith.cmpi eq, %arg1, %c0_i32_7 : i32
    %11 = arith.extui %10 : i1 to i32
    %c0_i32_8 = arith.constant 0 : i32
    %12 = arith.cmpi ne, %11, %c0_i32_8 : i32
    scf.if %12 {
      %c0_9 = arith.constant 0 : index
      %c0_10 = arith.constant 0 : index
      %13 = vector.load %arg8[%c0_9, %c0_10] : memref<8x1xf32, #tpu.memory_space<vmem>>, vector<8x1xf32>
      %cst_11 = arith.constant 3.906250e-03 : f32
      %14 = vector.broadcast %cst_11 : f32 to vector<8x1xf32>
      %15 = arith.mulf %13, %14 : vector<8x1xf32>
      %c0_12 = arith.constant 0 : index
      %c0_13 = arith.constant 0 : index
      %16 = vector.load %arg3[%c0_12, %c0_13] : memref<2x8xf32, #tpu.memory_space<vmem>>, vector<2x8xf32>
      %cst_14 = arith.constant dense<0.000000e+00> : vector<2x1xf32>
      %17 = tpu.matmul %16, %15, %cst_14 {dimension_numbers = #tpu.dot_dimension_numbers<[1], [0], [0], [1], [0, 0, 1, 1], [], []>} : vector<2x8xf32>, vector<8x1xf32>, vector<2x1xf32> -> vector<2x1xf32>
      %c0_15 = arith.constant 0 : index
      %c0_16 = arith.constant 0 : index
      %18 = vector.load %arg4[%c0_15, %c0_16] : memref<2x1xf32, #tpu.memory_space<vmem>>, vector<2x1xf32>
      %19 = arith.addf %17, %18 : vector<2x1xf32>
      %cst_17 = arith.constant 0.000000e+00 : f32
      %20 = vector.broadcast %cst_17 : f32 to vector<2x1xf32>
      %21 = arith.maximumf %19, %20 : vector<2x1xf32>
      %c0_18 = arith.constant 0 : index
      %c0_19 = arith.constant 0 : index
      %22 = vector.load %arg5[%c0_18, %c0_19] : memref<8x2xf32, #tpu.memory_space<vmem>>, vector<8x2xf32>
      %cst_20 = arith.constant dense<0.000000e+00> : vector<8x1xf32>
      %23 = tpu.matmul %22, %21, %cst_20 {dimension_numbers = #tpu.dot_dimension_numbers<[1], [0], [0], [1], [0, 0, 1, 1], [], []>} : vector<8x2xf32>, vector<2x1xf32>, vector<8x1xf32> -> vector<8x1xf32>
      %c0_21 = arith.constant 0 : index
      %c0_22 = arith.constant 0 : index
      %24 = vector.load %arg6[%c0_21, %c0_22] : memref<8x1xf32, #tpu.memory_space<vmem>>, vector<8x1xf32>
      %25 = arith.addf %23, %24 : vector<8x1xf32>
      %26 = arith.negf %25 : vector<8x1xf32>
      %27 = math.exp %26 : vector<8x1xf32>
      %cst_23 = arith.constant 1.000000e+00 : f32
      %28 = vector.broadcast %cst_23 : f32 to vector<8x1xf32>
      %29 = arith.addf %28, %27 : vector<8x1xf32>
      %30 = arith.divf %28, %29 : vector<8x1xf32>
      %c0_24 = arith.constant 0 : index
      %c0_25 = arith.constant 0 : index
      %c0_26 = arith.constant 0 : index
      %31 = vector.load %arg7[%c0_24, %c0_25, %c0_26] : memref<1x8x1xf32, #tpu.memory_space<vmem>>, vector<1x8x1xf32>
      %32 = vector.shape_cast %31 : vector<1x8x1xf32> to vector<8x1xf32>
      %33 = vector.shape_cast %30 : vector<8x1xf32> to vector<1x8x1xf32>
      tpu.vector_store %arg7[%c0_24, %c0_25, %c0_26], %33 {strides = array<i32>} : memref<1x8x1xf32, #tpu.memory_space<vmem>>, vector<1x8x1xf32>,
    } else {
    }
    return
  }
  func.func @transform_0(%arg0: i32, %arg1: i32) -> (i32, i32, i32) {
    %c0_i32 = arith.constant 0 : i32
    %c0_i32_0 = arith.constant 0 : i32
    return %arg0, %c0_i32, %arg1 : i32, i32, i32
  }
  func.func @transform_1(%arg0: i32, %arg1: i32) -> (i32, i32) {
    %c0_i32 = arith.constant 0 : i32
    %c0_i32_0 = arith.constant 0 : i32
    %c0_i32_1 = arith.constant 0 : i32
    return %c0_i32, %c0_i32_0 : i32, i32
  }
  func.func @transform_2(%arg0: i32, %arg1: i32) -> (i32, i32) {
    %c0_i32 = arith.constant 0 : i32
    %c0_i32_0 = arith.constant 0 : i32
    %c0_i32_1 = arith.constant 0 : i32
    return %c0_i32, %c0_i32_0 : i32, i32
  }
  func.func @transform_3(%arg0: i32, %arg1: i32) -> (i32, i32) {
    %c0_i32 = arith.constant 0 : i32
    %c0_i32_0 = arith.constant 0 : i32
    %c0_i32_1 = arith.constant 0 : i32
    return %c0_i32, %c0_i32_0 : i32, i32
  }
  func.func @transform_4(%arg0: i32, %arg1: i32) -> (i32, i32) {
    %c0_i32 = arith.constant 0 : i32
    %c0_i32_0 = arith.constant 0 : i32
    %c0_i32_1 = arith.constant 0 : i32
    return %c0_i32, %c0_i32_0 : i32, i32
  }
  func.func @transform_5(%arg0: i32, %arg1: i32) -> (i32, i32, i32) {
    %c0_i32 = arith.constant 0 : i32
    %c0_i32_0 = arith.constant 0 : i32
    %c0_i32_1 = arith.constant 0 : i32
    return %arg0, %c0_i32, %c0_i32_0 : i32, i32, i32
  }
}

module attributes {stable_mosaic.version = 11 : i64} {
  func.func @_scale_kernel(%arg0: i32, %arg1: i32, %arg2: memref<1x8x256xf32, #tpu.memory_space<vmem>>, %arg3: memref<1x8x1xf32, #tpu.memory_space<vmem>>, %arg4: memref<1x8x256xf32, #tpu.memory_space<vmem>>) attributes {dimension_semantics = [#tpu.dimension_semantics<parallel>, #tpu.dimension_semantics<parallel>], iteration_bounds = array<i64: 2, 1>, scalar_prefetch = 0 : i64, scratch_operands = 0 : i64, tpu.core_type = #tpu.core_type<tc>, window_params = [{transform_indices = @transform_0, window_bounds = array<i64: 1, 8, 256>}, {transform_indices = @transform_1, window_bounds = array<i64: 1, 8, 1>}, {transform_indices = @transform_2, window_bounds = array<i64: 1, 8, 256>}]} {
    %c0 = arith.constant 0 : index
    %c0_0 = arith.constant 0 : index
    %c0_1 = arith.constant 0 : index
    %0 = vector.load %arg2[%c0, %c0_0, %c0_1] : memref<1x8x256xf32, #tpu.memory_space<vmem>>, vector<1x8x256xf32>
    %1 = vector.shape_cast %0 : vector<1x8x256xf32> to vector<8x256xf32>
    %c0_2 = arith.constant 0 : index
    %c0_3 = arith.constant 0 : index
    %c0_4 = arith.constant 0 : index
    %2 = vector.load %arg3[%c0_2, %c0_3, %c0_4] : memref<1x8x1xf32, #tpu.memory_space<vmem>>, vector<1x8x1xf32>
    %3 = vector.shape_cast %2 : vector<1x8x1xf32> to vector<8x1xf32>
    %4 = vector.broadcast %3 : vector<8x1xf32> to vector<8x256xf32>
    %5 = arith.mulf %1, %4 : vector<8x256xf32>
    %c0_5 = arith.constant 0 : index
    %c0_6 = arith.constant 0 : index
    %c0_7 = arith.constant 0 : index
    %6 = vector.load %arg4[%c0_5, %c0_6, %c0_7] : memref<1x8x256xf32, #tpu.memory_space<vmem>>, vector<1x8x256xf32>
    %7 = vector.shape_cast %6 : vector<1x8x256xf32> to vector<8x256xf32>
    %8 = vector.shape_cast %5 : vector<8x256xf32> to vector<1x8x256xf32>
    tpu.vector_store %arg4[%c0_5, %c0_6, %c0_7], %8 {strides = array<i32>} : memref<1x8x256xf32, #tpu.memory_space<vmem>>, vector<1x8x256xf32>,
    return
  }
  func.func @transform_0(%arg0: i32, %arg1: i32) -> (i32, i32, i32) {
    %c0_i32 = arith.constant 0 : i32
    %c0_i32_0 = arith.constant 0 : i32
    return %arg0, %c0_i32, %arg1 : i32, i32, i32
  }
  func.func @transform_1(%arg0: i32, %arg1: i32) -> (i32, i32, i32) {
    %c0_i32 = arith.constant 0 : i32
    %c0_i32_0 = arith.constant 0 : i32
    %c0_i32_1 = arith.constant 0 : i32
    return %arg0, %c0_i32, %c0_i32_0 : i32, i32, i32
  }
  func.func @transform_2(%arg0: i32, %arg1: i32) -> (i32, i32, i32) {
    %c0_i32 = arith.constant 0 : i32
    %c0_i32_0 = arith.constant 0 : i32
    return %arg0, %c0_i32, %arg1 : i32, i32, i32
  }
}

</mosaic_0001>

<bundles_post_ra>
// kernel: squeeze_excite_forward.3
= control target key start
LH: loop header
LB: loop body
LE: loop exit
PB: predicated region body
PF: predicated region fallthrough
CT: control target
= control target key end

     0   :  { %s391_s9 = smov 0   ;;  %s393_s10 = smov 0   ;;  %s424_s0 = inlined_call_operand.vmem [shape: f32[2,8,256], index: 0, kind: input, shape index: {}]   ;;  %s425_s1 = inlined_call_operand.vmem [shape: f32[2,8,1], index: 1, kind: input, shape index: {}]   ;;  %s426_s2 = inlined_call_operand.vmem [shape: f32[2,8,256], index: 2, kind: output, shape index: {}]  }
   0x1   :  { %s395_s11 = smov 0  }
   0x2 LB: > { %s24_s12 = sadd.s32 1, %s369_s10  ;;  %p315_p0 = scmp.ge.s32.totalorder %s373_s11, 1  ;;  %s373_s11 = sphi %s395_s11, %s12_s11   ;;  %s369_s10 = sphi %s393_s10, %s428_s10   ;;  %s365_s9 = sphi %s391_s9, %s427_s9  }
   0x3   : > { %p26_p1 = scmp.ge.s32.totalorder %s24_s12, 2  ;;  %p142_p2 = scmp.lt.s32.totalorder %s373_s11, 3 }
   0x5   : > { %s430_s12 = smov (%p26_p1, %s24_s12), 0  ;;  %p143_p3 = pnand %p315_p0, %p142_p2 }
   0x6   : > { %p177_p4 = scmp.lt.s32.totalorder (!%p143_p3), %s365_s9, 1  ;;  %v375_v0 = vmov (!%p143_p3), 0  }
   0x7   : > { %146 = sbr.rel (%p143_p3) target bundleno = 149 (0x95), region = 28  ;;  %350 = vset.pattern.permute.xlu0 (!%p143_p3), %v375_v0 }
   0xe   : > { %s432_s9 = smov (!%p177_p4, %s365_s9), 1 }
   0xf   : > { %s318_s13 = sshll.u32 %s432_s9, 3  ;;  %s323_s17 = sshll.u32 %s432_s9, 4 }
  0x10   : > { %s189_s16 = scalar_lea.vmem %s425_s1, %s318_s13  ;;  %s184_s20 = scalar_lea.vmem %s424_s0, %s323_s17 }
  0x11   : > { %v202_v1 = vld [vmem:[%s189_s16] sm:$0xff]  ;;  %v201_v3 = vld [vmem:[%s184_s20 + $0x8] sm:$0xff]  ;;  %s198_s23 = scalar_lea.vmem %s426_s2, %s323_s17 }
  0x12   : > { %205 = vperm.xlu0 %350, %v202_v1   ;;  %v200_v2 = vld [vmem:[%s184_s20] sm:$0xff] }
  0x91   : > { %v206_v4 = vpop.permute.xlu0 %205 }
  0x92   : > { %v208_v5 = vmul.f32 %v206_v4, %v200_v2  ;;  %v209_v6 = vmul.f32 %v206_v4, %v201_v3 }
  0x94   : > { %210 = vst [vmem:[%s198_s23] sm:$0xff] %v208_v5  ;;  %211 = vst [vmem:[%s198_s23 + $0x8] sm:$0xff] %v209_v6 }
  0x95 PF: > { %s12_s11 = sadd.s32 1, %s373_s11   ;;  %s427_s9 = smov %s369_s10 }
  0x96   : > { %p9_p5 = scmp.ge.s32.totalorder %s12_s11, 4   ;;  %s428_s10 = smov %s430_s12 }
  0x98   :  { %11 = sbr.rel (!%p9_p5) target bundleno = 2 (0x2), region = 61 }

// kernel: squeeze_excite_forward.2
= control target key start
LH: loop header
LB: loop body
LE: loop exit
PB: predicated region body
PF: predicated region fallthrough
CT: control target
= control target key end

     0   :  { %s617_s18 = smov 0   ;;  %s619_s19 = smov 0   ;;  %s669_s0 = inlined_call_operand.vmem [shape: f32[2,8,256], index: 0, kind: input, shape index: {}]   ;;  %s670_s1 = inlined_call_operand.vmem [shape: f32[2,8], index: 1, kind: input, shape index: {}]   ;;  %s671_s2 = inlined_call_operand.vmem [shape: f32[2,1], index: 2, kind: input, shape index: {}]   ;;  %s672_s3 = inlined_call_operand.vmem [shape: f32[8,2], index: 3, kind: input, shape index: {}]   ;;  %s673_s4 = inlined_call_operand.vmem [shape: f32[8,1], index: 4, kind: input, shape index: {}]   ;;  %s674_s5 = inlined_call_operand.vmem [shape: f32[2,8,1], index: 5, kind: output, shape index: {}]  }
   0x1   :  { %s621_s20 = smov 0  }
   0x2 LB: > { %s27_s21 = sadd.s32 1, %s579_s19  ;;  %p506_p0 = scmp.ge.s32.totalorder %s583_s20, 1  ;;  %s583_s20 = sphi %s621_s20, %s15_s20   ;;  %s579_s19 = sphi %s619_s19, %s676_s19   ;;  %s575_s18 = sphi %s617_s18, %s675_s18  }
   0x3   : > { %p29_p1 = scmp.ge.s32.totalorder %s27_s21, 2  ;;  %p206_p2 = scmp.lt.s32.totalorder %s583_s20, 3 }
   0x5   : > { %s678_s21 = smov (%p29_p1, %s27_s21), 0  ;;  %p207_p3 = pnand %p506_p0, %p206_p2 }
   0x6   : > { %p238_p4 = scmp.lt.s32.totalorder (!%p207_p3), %s575_s18, 1  ;;  %vm255_vm0 = vcmask (!%p207_p3), 7168   ;;  %v585_v0 = vmov (!%p207_p3), 0.0   ;;  %vm586_vm1 = vmmov (!%p207_p3), 0   ;;  %v271_v9 = vld [vmem:[%s670_s1] sm:$0x3] (!%p207_p3) }
   0x7   : > { %210 = sbr.rel (%p207_p3) target bundleno = 633 (0x279), region = 40  ;;  %256 = vst.msk [vmem:[#allocation2] sm:$0xff] (!%p207_p3), %vm255_vm0, %v585_v0  ;;  %521 = vmatprep.subr.mxu0 (!%p207_p3), %v585_v0  ;;  %526 = vmatprep.subr.mxu1 (!%p207_p3), %v585_v0  ;;  %vm273_vm2 = vcmask (!%p207_p3), 64512   ;;  %v272_v10 = vld [vmem:[%s671_s2] sm:$0x3] (!%p207_p3)  ;;  %vm354_vm3 = vcmask (!%p207_p3), 1041408  }
   0x8   : > { %523 = vmatprep.mubr.msk.f32.mxu0 (!%p207_p3), %vm586_vm1, %v585_v0  ;;  %528 = vmatprep.mubr.msk.f32.mxu1 (!%p207_p3), %vm586_vm1, %v585_v0  ;;  %v348_v15 = vld [vmem:[%s672_s3] sm:$0xff] (!%p207_p3)  ;;  %vm350_vm4 = vcmask (!%p207_p3), 15360  }
   0x9   : > { %v349_v16 = vld [vmem:[%s673_s4] sm:$0xff] (!%p207_p3) }
   0xe   : > { %s680_s18 = smov (!%p238_p4, %s575_s18), 1  ;;  %v259_v4 = vld [vmem:[#allocation2] sm:$0xff] }
   0xf   : > { %s516_s22 = sshll.u32 %s680_s18, 4  ;;  %s509_s9 = sshll.u32 %s680_s18, 3 }
  0x10   : > { %s245_s25 = scalar_lea.vmem %s669_s0, %s516_s22  ;;  %s250_s12 = scalar_lea.vmem %s674_s5, %s509_s9 }
  0x11   : > { %v257_v1 = vld [vmem:[%s245_s25] sm:$0xff]  ;;  %v258_v2 = vld [vmem:[%s245_s25 + $0x8] sm:$0xff] }
  0x12   : > { %v260_v3 = vadd.f32 %v258_v2, %v257_v1 }
  0x14   : > { %261 = vadd.xlane.f32.xlu0 %v260_v3 }
  0xa1   : > { %v262_v5 = vpop.xlane.xlu0 %261 }
  0xa2   : > { %v263_v6 = vadd.f32 %v262_v5, %v259_v4 }
  0xa4   : > { %265 = vst.msk [vmem:[#allocation2] sm:$0xff] %vm255_vm0, %v263_v6 }
  0xab   : > { %v269_v7 = vld [vmem:[#allocation2] sm:$0xff] }
  0xac   : > { %v270_v8 = vmul.f32 0.00390625, %v269_v7 }
  0xae   : > { %522 = vmatpush3.msra.mxu0 %v270_v8 }
  0xaf   : > { %524 = vmatmul.mubr.msk.f32.vlgmr.msra.gmra.mrb[0].mxu0 %vm273_vm2, %v271_v9 }
 0x182   : > { %v343_v11 = vpop.f32.mrb[0].mxu0 }
 0x183   : > { %v344_v12 = vadd.f32 %v343_v11, %v272_v10  ;;  %v525_v13 = vpop.f32.mrb[1].mxu0 }
 0x185   : > { %v347_v14 = vmax.f32 %v344_v12, 0.0 }
 0x187   : > { %527 = vmatpush3.msk.msra.mxu1 %vm354_vm3, %v347_v14 }
 0x188   : > { %529 = vmatmul.mubr.msk.f32.vlgmr.msra.gmra.mrb[0].mxu1 %vm350_vm4, %v348_v15 }
 0x25b   : > { %v424_v17 = vpop.f32.mrb[0].mxu1 }
 0x25c   : > { %v425_v18 = vadd.f32 %v424_v17, %v349_v16  ;;  %v530_v19 = vpop.f32.mrb[1].mxu1 }
 0x25e   : > { %v513_v20 = vmul.f32 -1.442695, %v425_v18 }
 0x260   : > { %557 = vpow2.f32 %v513_v20 }
 0x26a   : > { %v558_v21 = vpop.eup %557 }
 0x26b   : > { %v431_v22 = vadd.f32 1.0, %v558_v21 }
 0x26d   : > { %559 = vrcp.f32 %v431_v22 }
 0x277   : > { %v560_v23 = vpop.eup %559 }
 0x278   : > { %434 = vst.msk [vmem:[%s250_s12] sm:$0xff] %vm255_vm0, %v560_v23 }
 0x279 PF: > { %s15_s20 = sadd.s32 1, %s583_s20   ;;  %s675_s18 = smov %s579_s19 }
 0x27a   : > { %p12_p5 = scmp.ge.s32.totalorder %s15_s20, 4   ;;  %s676_s19 = smov %s678_s21 }
 0x27c   :  { %14 = sbr.rel (!%p12_p5) target bundleno = 2 (0x2), region = 78 }

</bundles_post_ra>
